<compile_context>
chip_gen: v7x
topology: tpu7x:2x2x1
jax: 0.10.0
libtpu: 0.0.40
codegen_flags: <defaults>
</compile_context>

<pallas_src>
import functools

import jax
import jax.numpy as jnp
from jax.experimental import pallas as pl
from jax.experimental.pallas import tpu as pltpu


def _cbam_spatial_kernel(w_ref, b_ref, x_ref, o_ref, *, H, W):
    # w_ref: (18,) f32 SMEM -- conv weight flattened as (in=2, kh=3, kw=3)
    # b_ref: (1,)  f32 SMEM -- conv bias
    # x_ref/o_ref: (bB, C, H*W) VMEM -- lane-dense batch blocks
    bB, C, HW = x_ref.shape

    # ---- fused channel pooling: one pass over C builds max and f32 sum -----
    x0 = x_ref[:, 0, :]
    max_pool = x0
    sum_pool = x0.astype(jnp.float32)
    for c in range(1, C):
        xc = x_ref[:, c, :]
        max_pool = jnp.maximum(max_pool, xc)
        sum_pool = sum_pool + xc.astype(jnp.float32)
    pools = (max_pool.astype(jnp.float32),       # channel 0 of the conv: max
             sum_pool * (1.0 / C))               # channel 1 of the conv: mean

    # ---- 3x3 conv (padding=1) on the flattened pooled maps -----------------
    # Tap (oy, ox) at flat index i reads p[i + oy*W + ox] (zero padded).
    # pltpu.roll is circular, so boundary validity is restored with masks:
    #   column mask (per ox): source column x+ox must lie in [0, W)
    #   row mask    (per oy): source row    y+oy must lie in [0, H)
    flat = jax.lax.broadcasted_iota(jnp.int32, (1, HW), 1)
    col = flat % W
    col_ok = {-1: col >= 1, 1: col < (W - 1)}
    row_ok = {-1: flat >= W, 1: flat < (HW - W)}

    # Column-shifted, column-masked pooled maps: q[ci][ox][i] == p_ci[i + ox].
    q = []
    for p in pools:
        qc = {0: p}
        for ox in (-1, 1):
            shifted = pltpu.roll(p, (-ox) % HW, axis=1)   # lane roll (XLU)
            qc[ox] = jnp.where(col_ok[ox], shifted, 0.0)
        q.append(qc)

    def w(ci, oy, ox):                                    # SMEM scalar read
        return w_ref[ci * 9 + (oy + 1) * 3 + (ox + 1)]

    acc = jnp.full((bB, HW), b_ref[0], jnp.float32)
    for oy in (-1, 0, 1):
        # combine both channels' three column taps for this row offset first,
        # so the row roll + row mask are applied once per oy
        s = None
        for ci in range(2):
            for ox in (-1, 0, 1):
                t = w(ci, oy, ox) * q[ci][ox]
                s = t if s is None else s + t
        if oy != 0:
            s = pltpu.roll(s, (-oy * W) % HW, axis=1)     # row shift = oy*W
            s = jnp.where(row_ok[oy], s, 0.0)
        acc = acc + s

    # sigmoid = 1 / (1 + exp(-acc)); exp goes to the EUP. approx=False keeps
    # full f32 precision (the map is tiny, so the extra cost is negligible);
    # flip to approx=True if downstream precision allows.
    att = pl.reciprocal(1.0 + jnp.exp(-acc), approx=False)

    # ---- scale the input: lane-dense per-channel read / multiply / store ---
    scale = att.astype(x_ref.dtype)                       # keep big path in x dtype
    for c in range(C):
        o_ref[:, c, :] = (scale * x_ref[:, c, :]).astype(o_ref.dtype)


@jax.jit
def cbam_spatial(x, w, b):
    """x: (B, C, H, W); w: (1, 2, 3, 3); b: (1,) -> sigmoid(conv([max,mean])) * x."""
    B, C, H, W = x.shape
    HW = H * W
    x_flat = x.reshape(B, C, HW)                 # free metadata reshape (contiguous NCHW)
    w_flat = w.reshape(-1).astype(jnp.float32)   # (18,)
    b_flat = b.reshape(-1).astype(jnp.float32)   # (1,)

    # Block sizing: aim for ~8 MiB input blocks (per-step overhead <~5-7% even
    # at v7x HBM BW), but always keep >= 2 grid steps so v7x's second
    # TensorCore gets work and input/output DMAs pipeline across steps.
    # Ragged last block via cdiv -- batches are independent, padded rows are
    # discarded on writeback.
    per_batch_bytes = C * HW * x.dtype.itemsize
    target_bytes = 8 << 20
    bB = max(1, min(B, target_bytes // max(per_batch_bytes, 1)))
    if B >= 2:
        bB = min(bB, pl.cdiv(B, 2))
    grid = (pl.cdiv(B, bB),)
    # TODO(synk): add an H-tiled (1-row halo) grid axis for single images whose
    # C*H*W block no longer fits the VMEM budget (hits sooner on v7x's 64 MiB).
    # NOTE: HW that is not a multiple of 128 (e.g. 14x14, 28x28) works but pays
    # masked partial stores on the lane axis.

    kernel = functools.partial(_cbam_spatial_kernel, H=H, W=W)
    out = pl.pallas_call(
        kernel,
        out_shape=jax.ShapeDtypeStruct((B, C, HW), x.dtype),
        grid=grid,
        in_specs=[
            pl.BlockSpec(memory_space=pltpu.MemorySpace.SMEM),   # conv weight (18,)
            pl.BlockSpec(memory_space=pltpu.MemorySpace.SMEM),   # conv bias (1,)
            pl.BlockSpec((bB, C, HW), lambda i: (i, 0, 0)),      # lane-dense x block
        ],
        out_specs=pl.BlockSpec((bB, C, HW), lambda i: (i, 0, 0)),
        compiler_params=pltpu.CompilerParams(
            dimension_semantics=("parallel",),
            # 48 MiB: enough for 2x double-buffered 8 MiB blocks + scratch,
            # while leaving headroom on v7x's 64 MiB physical VMEM.
            vmem_limit_bytes=48 * 1024 * 1024,
        ),
    )(w_flat, b_flat, x_flat)
    return out.reshape(B, C, H, W)


def cbam_spatial_ref(x, w, b):
    """Pure-JAX reference matching the PyTorch forward."""
    max_pool = jnp.max(x, axis=1, keepdims=True)
    mean_pool = jnp.mean(x, axis=1, keepdims=True)
    pool = jnp.concatenate([max_pool, mean_pool], axis=1)        # (B, 2, H, W)
    out = jax.lax.conv_general_dilated(
        pool, w, window_strides=(1, 1), padding=((1, 1), (1, 1)),
        dimension_numbers=("NCHW", "OIHW", "NCHW"))
    out = out + b.reshape(1, -1, 1, 1)
    return jax.nn.sigmoid(out) * x


if __name__ == "__main__":
    key = jax.random.PRNGKey(0)
    kx, kw, kb = jax.random.split(key, 3)

    B, C, H, W = 2, 4, 16, 16
    x = jax.random.normal(kx, (B, C, H, W), dtype=jnp.float32)

    # deterministic conv2d(2 -> 1, k=3) parameters (PyTorch-style uniform bound)
    fan_in = 2 * 3 * 3
    bound = 1.0 / (fan_in ** 0.5)
    w = jax.random.uniform(kw, (1, 2, 3, 3), jnp.float32, -bound, bound)
    b = jax.random.uniform(kb, (1,), jnp.float32, -bound, bound)

    out = jax.block_until_ready(cbam_spatial(x, w, b))

    ref = cbam_spatial_ref(x, w, b)
    assert out.shape == (B, C, H, W)
    assert jnp.allclose(out, ref, atol=1e-5, rtol=1e-5), "mismatch vs reference"

    print("KERNEL_OK")
</pallas_src>

<mosaic_0001>
module attributes {stable_mosaic.version = 11 : i64} {
  func.func @_cbam_spatial_kernel(%arg0: i32, %arg1: memref<18xf32, #tpu.memory_space<smem>>, %arg2: memref<1xf32, #tpu.memory_space<smem>>, %arg3: memref<1x4x256xf32, #tpu.memory_space<vmem>>, %arg4: memref<1x4x256xf32, #tpu.memory_space<vmem>>) attributes {dimension_semantics = [#tpu.dimension_semantics<parallel>], iteration_bounds = array<i64: 2>, scalar_prefetch = 0 : i64, scratch_operands = 0 : i64, tpu.core_type = #tpu.core_type<tc>, window_params = [{transform_indices = @transform_0, window_bounds = array<i64: 18>}, {transform_indices = @transform_1, window_bounds = array<i64: 1>}, {transform_indices = @transform_2, window_bounds = array<i64: 1, 4, 256>}, {transform_indices = @transform_3, window_bounds = array<i64: 1, 4, 256>}]} {
    %c0 = arith.constant 0 : index
    %c0_0 = arith.constant 0 : index
    %c0_1 = arith.constant 0 : index
    %0 = vector.load %arg3[%c0, %c0_0, %c0_1] : memref<1x4x256xf32, #tpu.memory_space<vmem>>, vector<1x1x256xf32>
    %1 = vector.shape_cast %0 : vector<1x1x256xf32> to vector<1x256xf32>
    %c0_2 = arith.constant 0 : index
    %c1 = arith.constant 1 : index
    %c0_3 = arith.constant 0 : index
    %2 = vector.load %arg3[%c0_2, %c1, %c0_3] : memref<1x4x256xf32, #tpu.memory_space<vmem>>, vector<1x1x256xf32>
    %3 = vector.shape_cast %2 : vector<1x1x256xf32> to vector<1x256xf32>
    %4 = arith.maximumf %1, %3 : vector<1x256xf32>
    %5 = arith.addf %1, %3 : vector<1x256xf32>
    %c0_4 = arith.constant 0 : index
    %c2 = arith.constant 2 : index
    %c0_5 = arith.constant 0 : index
    %6 = vector.load %arg3[%c0_4, %c2, %c0_5] : memref<1x4x256xf32, #tpu.memory_space<vmem>>, vector<1x1x256xf32>
    %7 = vector.shape_cast %6 : vector<1x1x256xf32> to vector<1x256xf32>
    %8 = arith.maximumf %4, %7 : vector<1x256xf32>
    %9 = arith.addf %5, %7 : vector<1x256xf32>
    %c0_6 = arith.constant 0 : index
    %c3 = arith.constant 3 : index
    %c0_7 = arith.constant 0 : index
    %10 = vector.load %arg3[%c0_6, %c3, %c0_7] : memref<1x4x256xf32, #tpu.memory_space<vmem>>, vector<1x1x256xf32>
    %11 = vector.shape_cast %10 : vector<1x1x256xf32> to vector<1x256xf32>
    %12 = arith.maximumf %8, %11 : vector<1x256xf32>
    %13 = arith.addf %9, %11 : vector<1x256xf32>
    %cst = arith.constant 2.500000e-01 : f32
    %14 = vector.broadcast %cst : f32 to vector<1x256xf32>
    %15 = arith.mulf %13, %14 : vector<1x256xf32>
    %16 = tpu.iota {dimensions = array<i32: 1>} : vector<1x256xi32>
    %c16_i32 = arith.constant 16 : i32
    %c0_i32 = arith.constant 0 : i32
    %17 = arith.cmpi eq, %c16_i32, %c0_i32 : i32
    %c1_i32 = arith.constant 1 : i32
    %18 = arith.select %17, %c1_i32, %c16_i32 : i32
    %19 = vector.broadcast %18 : i32 to vector<1x256xi32>
    %20 = arith.remsi %16, %19 : vector<1x256xi32>
    %c0_i32_8 = arith.constant 0 : i32
    %21 = vector.broadcast %c0_i32_8 : i32 to vector<1x256xi32>
    %22 = arith.cmpi ne, %20, %21 : vector<1x256xi32>
    %c0_i32_9 = arith.constant 0 : i32
    %23 = vector.broadcast %c0_i32_9 : i32 to vector<1x256xi32>
    %24 = arith.cmpi slt, %20, %23 : vector<1x256xi32>
    %c0_i32_10 = arith.constant 0 : i32
    %25 = arith.cmpi slt, %18, %c0_i32_10 : i32
    %26 = vector.broadcast %25 : i1 to vector<1x256xi1>
    %27 = vector.broadcast %26 : vector<1x256xi1> to vector<1x256xi1>
    %28 = arith.xori %24, %27 : vector<1x256xi1>
    %29 = arith.andi %28, %22 : vector<1x256xi1>
    %30 = vector.broadcast %18 : i32 to vector<1x256xi32>
    %31 = arith.addi %20, %30 : vector<1x256xi32>
    %32 = arith.select %29, %31, %20 : vector<1x256xi1>, vector<1x256xi32>
    %c1_i32_11 = arith.constant 1 : i32
    %33 = vector.broadcast %c1_i32_11 : i32 to vector<1x256xi32>
    %34 = arith.cmpi sge, %32, %33 : vector<1x256xi32>
    %c15_i32 = arith.constant 15 : i32
    %35 = vector.broadcast %c15_i32 : i32 to vector<1x256xi32>
    %36 = arith.cmpi slt, %32, %35 : vector<1x256xi32>
    %c16_i32_12 = arith.constant 16 : i32
    %37 = vector.broadcast %c16_i32_12 : i32 to vector<1x256xi32>
    %38 = arith.cmpi sge, %16, %37 : vector<1x256xi32>
    %c240_i32 = arith.constant 240 : i32
    %39 = vector.broadcast %c240_i32 : i32 to vector<1x256xi32>
    %40 = arith.cmpi slt, %16, %39 : vector<1x256xi32>
    %c1_i32_13 = arith.constant 1 : i32
    %41 = tpu.dynamic_rotate %12 by %c1_i32_13 dim 1 : vector<1x256xf32>, i32 -> vector<1x256xf32>
    %cst_14 = arith.constant 0.000000e+00 : f32
    %42 = vector.broadcast %cst_14 : f32 to vector<1x256xf32>
    %43 = arith.select %34, %41, %42 : vector<1x256xi1>, vector<1x256xf32>
    %c255_i32 = arith.constant 255 : i32
    %44 = tpu.dynamic_rotate %12 by %c255_i32 dim 1 : vector<1x256xf32>, i32 -> vector<1x256xf32>
    %cst_15 = arith.constant 0.000000e+00 : f32
    %45 = vector.broadcast %cst_15 : f32 to vector<1x256xf32>
    %46 = arith.select %36, %44, %45 : vector<1x256xi1>, vector<1x256xf32>
    %c1_i32_16 = arith.constant 1 : i32
    %47 = tpu.dynamic_rotate %15 by %c1_i32_16 dim 1 : vector<1x256xf32>, i32 -> vector<1x256xf32>
    %cst_17 = arith.constant 0.000000e+00 : f32
    %48 = vector.broadcast %cst_17 : f32 to vector<1x256xf32>
    %49 = arith.select %34, %47, %48 : vector<1x256xi1>, vector<1x256xf32>
    %c255_i32_18 = arith.constant 255 : i32
    %50 = tpu.dynamic_rotate %15 by %c255_i32_18 dim 1 : vector<1x256xf32>, i32 -> vector<1x256xf32>
    %cst_19 = arith.constant 0.000000e+00 : f32
    %51 = vector.broadcast %cst_19 : f32 to vector<1x256xf32>
    %52 = arith.select %36, %50, %51 : vector<1x256xi1>, vector<1x256xf32>
    %c0_20 = arith.constant 0 : index
    %53 = memref.load %arg2[%c0_20] : memref<1xf32, #tpu.memory_space<smem>>
    %54 = vector.broadcast %53 : f32 to vector<1x256xf32>
    %c0_21 = arith.constant 0 : index
    %55 = memref.load %arg1[%c0_21] : memref<18xf32, #tpu.memory_space<smem>>
    %56 = vector.broadcast %55 : f32 to vector<1x256xf32>
    %57 = arith.mulf %56, %43 : vector<1x256xf32>
    %c1_22 = arith.constant 1 : index
    %58 = memref.load %arg1[%c1_22] : memref<18xf32, #tpu.memory_space<smem>>
    %59 = vector.broadcast %58 : f32 to vector<1x256xf32>
    %60 = arith.mulf %59, %12 : vector<1x256xf32>
    %61 = arith.addf %57, %60 : vector<1x256xf32>
    %c2_23 = arith.constant 2 : index
    %62 = memref.load %arg1[%c2_23] : memref<18xf32, #tpu.memory_space<smem>>
    %63 = vector.broadcast %62 : f32 to vector<1x256xf32>
    %64 = arith.mulf %63, %46 : vector<1x256xf32>
    %65 = arith.addf %61, %64 : vector<1x256xf32>
    %c9 = arith.constant 9 : index
    %66 = memref.load %arg1[%c9] : memref<18xf32, #tpu.memory_space<smem>>
    %67 = vector.broadcast %66 : f32 to vector<1x256xf32>
    %68 = arith.mulf %67, %49 : vector<1x256xf32>
    %69 = arith.addf %65, %68 : vector<1x256xf32>
    %c10 = arith.constant 10 : index
    %70 = memref.load %arg1[%c10] : memref<18xf32, #tpu.memory_space<smem>>
    %71 = vector.broadcast %70 : f32 to vector<1x256xf32>
    %72 = arith.mulf %71, %15 : vector<1x256xf32>
    %73 = arith.addf %69, %72 : vector<1x256xf32>
    %c11 = arith.constant 11 : index
    %74 = memref.load %arg1[%c11] : memref<18xf32, #tpu.memory_space<smem>>
    %75 = vector.broadcast %74 : f32 to vector<1x256xf32>
    %76 = arith.mulf %75, %52 : vector<1x256xf32>
    %77 = arith.addf %73, %76 : vector<1x256xf32>
    %c16_i32_24 = arith.constant 16 : i32
    %78 = tpu.dynamic_rotate %77 by %c16_i32_24 dim 1 : vector<1x256xf32>, i32 -> vector<1x256xf32>
    %cst_25 = arith.constant 0.000000e+00 : f32
    %79 = vector.broadcast %cst_25 : f32 to vector<1x256xf32>
    %80 = arith.select %38, %78, %79 : vector<1x256xi1>, vector<1x256xf32>
    %81 = arith.addf %54, %80 : vector<1x256xf32>
    %c3_26 = arith.constant 3 : index
    %82 = memref.load %arg1[%c3_26] : memref<18xf32, #tpu.memory_space<smem>>
    %83 = vector.broadcast %82 : f32 to vector<1x256xf32>
    %84 = arith.mulf %83, %43 : vector<1x256xf32>
    %c4 = arith.constant 4 : index
    %85 = memref.load %arg1[%c4] : memref<18xf32, #tpu.memory_space<smem>>
    %86 = vector.broadcast %85 : f32 to vector<1x256xf32>
    %87 = arith.mulf %86, %12 : vector<1x256xf32>
    %88 = arith.addf %84, %87 : vector<1x256xf32>
    %c5 = arith.constant 5 : index
    %89 = memref.load %arg1[%c5] : memref<18xf32, #tpu.memory_space<smem>>
    %90 = vector.broadcast %89 : f32 to vector<1x256xf32>
    %91 = arith.mulf %90, %46 : vector<1x256xf32>
    %92 = arith.addf %88, %91 : vector<1x256xf32>
    %c12 = arith.constant 12 : index
    %93 = memref.load %arg1[%c12] : memref<18xf32, #tpu.memory_space<smem>>
    %94 = vector.broadcast %93 : f32 to vector<1x256xf32>
    %95 = arith.mulf %94, %49 : vector<1x256xf32>
    %96 = arith.addf %92, %95 : vector<1x256xf32>
    %c13 = arith.constant 13 : index
    %97 = memref.load %arg1[%c13] : memref<18xf32, #tpu.memory_space<smem>>
    %98 = vector.broadcast %97 : f32 to vector<1x256xf32>
    %99 = arith.mulf %98, %15 : vector<1x256xf32>
    %100 = arith.addf %96, %99 : vector<1x256xf32>
    %c14 = arith.constant 14 : index
    %101 = memref.load %arg1[%c14] : memref<18xf32, #tpu.memory_space<smem>>
    %102 = vector.broadcast %101 : f32 to vector<1x256xf32>
    %103 = arith.mulf %102, %52 : vector<1x256xf32>
    %104 = arith.addf %100, %103 : vector<1x256xf32>
    %105 = arith.addf %81, %104 : vector<1x256xf32>
    %c6 = arith.constant 6 : index
    %106 = memref.load %arg1[%c6] : memref<18xf32, #tpu.memory_space<smem>>
    %107 = vector.broadcast %106 : f32 to vector<1x256xf32>
    %108 = arith.mulf %107, %43 : vector<1x256xf32>
    %c7 = arith.constant 7 : index
    %109 = memref.load %arg1[%c7] : memref<18xf32, #tpu.memory_space<smem>>
    %110 = vector.broadcast %109 : f32 to vector<1x256xf32>
    %111 = arith.mulf %110, %12 : vector<1x256xf32>
    %112 = arith.addf %108, %111 : vector<1x256xf32>
    %c8 = arith.constant 8 : index
    %113 = memref.load %arg1[%c8] : memref<18xf32, #tpu.memory_space<smem>>
    %114 = vector.broadcast %113 : f32 to vector<1x256xf32>
    %115 = arith.mulf %114, %46 : vector<1x256xf32>
    %116 = arith.addf %112, %115 : vector<1x256xf32>
    %c15 = arith.constant 15 : index
    %117 = memref.load %arg1[%c15] : memref<18xf32, #tpu.memory_space<smem>>
    %118 = vector.broadcast %117 : f32 to vector<1x256xf32>
    %119 = arith.mulf %118, %49 : vector<1x256xf32>
    %120 = arith.addf %116, %119 : vector<1x256xf32>
    %c16 = arith.constant 16 : index
    %121 = memref.load %arg1[%c16] : memref<18xf32, #tpu.memory_space<smem>>
    %122 = vector.broadcast %121 : f32 to vector<1x256xf32>
    %123 = arith.mulf %122, %15 : vector<1x256xf32>
    %124 = arith.addf %120, %123 : vector<1x256xf32>
    %c17 = arith.constant 17 : index
    %125 = memref.load %arg1[%c17] : memref<18xf32, #tpu.memory_space<smem>>
    %126 = vector.broadcast %125 : f32 to vector<1x256xf32>
    %127 = arith.mulf %126, %52 : vector<1x256xf32>
    %128 = arith.addf %124, %127 : vector<1x256xf32>
    %c240_i32_27 = arith.constant 240 : i32
    %129 = tpu.dynamic_rotate %128 by %c240_i32_27 dim 1 : vector<1x256xf32>, i32 -> vector<1x256xf32>
    %cst_28 = arith.constant 0.000000e+00 : f32
    %130 = vector.broadcast %cst_28 : f32 to vector<1x256xf32>
    %131 = arith.select %40, %129, %130 : vector<1x256xi1>, vector<1x256xf32>
    %132 = arith.addf %105, %131 : vector<1x256xf32>
    %cst_29 = arith.constant 0.000000e+00 : f32
    %133 = vector.broadcast %cst_29 : f32 to vector<1x256xf32>
    %134 = arith.subf %133, %132 : vector<1x256xf32>
    %135 = math.exp %134 : vector<1x256xf32>
    %cst_30 = arith.constant 1.000000e+00 : f32
    %136 = vector.broadcast %cst_30 : f32 to vector<1x256xf32>
    %137 = arith.addf %136, %135 : vector<1x256xf32>
    %138 = tpu.reciprocal %137 : vector<1x256xf32> -> vector<1x256xf32>
    %c0_31 = arith.constant 0 : index
    %c0_32 = arith.constant 0 : index
    %c0_33 = arith.constant 0 : index
    %139 = vector.load %arg3[%c0_31, %c0_32, %c0_33] : memref<1x4x256xf32, #tpu.memory_space<vmem>>, vector<1x1x256xf32>
    %140 = vector.shape_cast %139 : vector<1x1x256xf32> to vector<1x256xf32>
    %141 = arith.mulf %138, %140 : vector<1x256xf32>
    %c0_34 = arith.constant 0 : index
    %c0_35 = arith.constant 0 : index
    %c0_36 = arith.constant 0 : index
    %142 = vector.load %arg4[%c0_34, %c0_35, %c0_36] : memref<1x4x256xf32, #tpu.memory_space<vmem>>, vector<1x1x256xf32>
    %143 = vector.shape_cast %142 : vector<1x1x256xf32> to vector<1x256xf32>
    %144 = vector.shape_cast %141 : vector<1x256xf32> to vector<1x1x256xf32>
    tpu.vector_store %arg4[%c0_34, %c0_35, %c0_36], %144 {strides = array<i32>} : memref<1x4x256xf32, #tpu.memory_space<vmem>>, vector<1x1x256xf32>,
    %c0_37 = arith.constant 0 : index
    %c1_38 = arith.constant 1 : index
    %c0_39 = arith.constant 0 : index
    %145 = vector.load %arg3[%c0_37, %c1_38, %c0_39] : memref<1x4x256xf32, #tpu.memory_space<vmem>>, vector<1x1x256xf32>
    %146 = vector.shape_cast %145 : vector<1x1x256xf32> to vector<1x256xf32>
    %147 = arith.mulf %138, %146 : vector<1x256xf32>
    %c0_40 = arith.constant 0 : index
    %c1_41 = arith.constant 1 : index
    %c0_42 = arith.constant 0 : index
    %148 = vector.load %arg4[%c0_40, %c1_41, %c0_42] : memref<1x4x256xf32, #tpu.memory_space<vmem>>, vector<1x1x256xf32>
    %149 = vector.shape_cast %148 : vector<1x1x256xf32> to vector<1x256xf32>
    %150 = vector.shape_cast %147 : vector<1x256xf32> to vector<1x1x256xf32>
    tpu.vector_store %arg4[%c0_40, %c1_41, %c0_42], %150 {strides = array<i32>} : memref<1x4x256xf32, #tpu.memory_space<vmem>>, vector<1x1x256xf32>,
    %c0_43 = arith.constant 0 : index
    %c2_44 = arith.constant 2 : index
    %c0_45 = arith.constant 0 : index
    %151 = vector.load %arg3[%c0_43, %c2_44, %c0_45] : memref<1x4x256xf32, #tpu.memory_space<vmem>>, vector<1x1x256xf32>
    %152 = vector.shape_cast %151 : vector<1x1x256xf32> to vector<1x256xf32>
    %153 = arith.mulf %138, %152 : vector<1x256xf32>
    %c0_46 = arith.constant 0 : index
    %c2_47 = arith.constant 2 : index
    %c0_48 = arith.constant 0 : index
    %154 = vector.load %arg4[%c0_46, %c2_47, %c0_48] : memref<1x4x256xf32, #tpu.memory_space<vmem>>, vector<1x1x256xf32>
    %155 = vector.shape_cast %154 : vector<1x1x256xf32> to vector<1x256xf32>
    %156 = vector.shape_cast %153 : vector<1x256xf32> to vector<1x1x256xf32>
    tpu.vector_store %arg4[%c0_46, %c2_47, %c0_48], %156 {strides = array<i32>} : memref<1x4x256xf32, #tpu.memory_space<vmem>>, vector<1x1x256xf32>,
    %c0_49 = arith.constant 0 : index
    %c3_50 = arith.constant 3 : index
    %c0_51 = arith.constant 0 : index
    %157 = vector.load %arg3[%c0_49, %c3_50, %c0_51] : memref<1x4x256xf32, #tpu.memory_space<vmem>>, vector<1x1x256xf32>
    %158 = vector.shape_cast %157 : vector<1x1x256xf32> to vector<1x256xf32>
    %159 = arith.mulf %138, %158 : vector<1x256xf32>
    %c0_52 = arith.constant 0 : index
    %c3_53 = arith.constant 3 : index
    %c0_54 = arith.constant 0 : index
    %160 = vector.load %arg4[%c0_52, %c3_53, %c0_54] : memref<1x4x256xf32, #tpu.memory_space<vmem>>, vector<1x1x256xf32>
    %161 = vector.shape_cast %160 : vector<1x1x256xf32> to vector<1x256xf32>
    %162 = vector.shape_cast %159 : vector<1x256xf32> to vector<1x1x256xf32>
    tpu.vector_store %arg4[%c0_52, %c3_53, %c0_54], %162 {strides = array<i32>} : memref<1x4x256xf32, #tpu.memory_space<vmem>>, vector<1x1x256xf32>,
    return
  }
  func.func @transform_0(%arg0: i32) -> i32 {
    %c0_i32 = arith.constant 0 : i32
    %c0_i32_0 = arith.constant 0 : i32
    return %c0_i32 : i32
  }
  func.func @transform_1(%arg0: i32) -> i32 {
    %c0_i32 = arith.constant 0 : i32
    %c0_i32_0 = arith.constant 0 : i32
    return %c0_i32 : i32
  }
  func.func @transform_2(%arg0: i32) -> (i32, i32, i32) {
    %c0_i32 = arith.constant 0 : i32
    %c0_i32_0 = arith.constant 0 : i32
    %c0_i32_1 = arith.constant 0 : i32
    return %arg0, %c0_i32, %c0_i32_0 : i32, i32, i32
  }
  func.func @transform_3(%arg0: i32) -> (i32, i32, i32) {
    %c0_i32 = arith.constant 0 : i32
    %c0_i32_0 = arith.constant 0 : i32
    %c0_i32_1 = arith.constant 0 : i32
    return %arg0, %c0_i32, %c0_i32_0 : i32, i32, i32
  }
}

</mosaic_0001>

<bundles_post_ra>
// kernel: cbam_spatial.1
= control target key start
LH: loop header
LB: loop body
LE: loop exit
PB: predicated region body
PF: predicated region fallthrough
CT: control target
= control target key end

     0   :  { %s1108_s0 = inlined_call_operand.vmem [shape: f32[18], index: 0, kind: input, shape index: {}]   ;;  %s1109_s1 = inlined_call_operand.<no memory space> [shape: f32[1], index: 1, kind: input, shape index: {}]   ;;  %s1110_s2 = inlined_call_operand.vmem [shape: f32[2,4,256], index: 2, kind: input, shape index: {}]   ;;  %s1111_s3 = inlined_call_operand.vmem [shape: f32[2,4,256], index: 3, kind: output, shape index: {}]  }
   0x1   :  { %8 = sst [smem:[#allocation2]] %s1109_s1 }
   0x2   :  { %9 = vsyncpa [#allocation4], 0  ;;  %s823_s14 = smov 0  }
   0x3 LB: > { %s694_s15 = sadd.s32 4294967295, %s792_s14   ;;  %p696_p0 = scmp.ge.s32.totalorder %s792_s14, 1  ;;  %s792_s14 = sphi %s823_s14, %s15_s14  }
   0x4   : > { %p114_p1 = scmp.lt.s32.totalorder %s792_s14, 3  ;;  %s127_s18 = sshll.u32 %s1108_s0, 4  ;;  %s128_s18 = int_to_ptr.vmem [resolvable:$true] %s127_s18 }
   0x5   : > { %p743_p3 = scmp.eq.s32.totalorder %s694_s15, 0  ;;  %s767_s19 = scalar_lea.vmem %s128_s18, 16 }
   0x6   : > { %p834_p2 = pnand %p696_p0, %p114_p1  ;;  %p768_p6 = scmp.ne.s32.totalorder %s128_s18, %s767_s19 }
   0x7   : > { %p775_p10 = scmp.lt.s32.totalorder %s128_s18, %s128_s18  ;;  %p776_p11 = scmp.lt.s32.totalorder %s767_s19, %s767_s19 }
   0x8   : > { %p739_p4 = pneg %p834_p2 }
   0x9   : > { %p777_p12 = por %p776_p11, %p775_p10 }
   0xa   : > { %p740_p5 = pnand %p743_p3, %p739_p4 }
   0xc   : > { %p769_p7 = pneg %p740_p5 }
   0xe   : > { %p770_p8 = pnand %p769_p7, %p768_p6 }
  0x10   : > { %p771_p9 = pneg %p770_p8 }
  0x12   : > { %p778_p13 = pnand %p777_p12, %p771_p9 }
  0x14   : > { %781 = shalt.err (!%p778_p13)
}
  0x15   : > { %s794_s20 = smov [#allocation3]   ;;  %151 = sbr.rel (%p834_p2) target bundleno = 345 (0x159), region = 32 }
  0x16   : > { %742 = dma.vmem_to_smem (!%p740_p5), %s128_s18, 16, %s794_s20, [#allocation4]  }
  0x1c   : > { %787 = dma.done.wait (%p743_p3), [#allocation4], 16  }
  0x1d   : > { %789 = vsyncadd (%p743_p3), [#allocation4], 4294967280 }
  0x1e   : > { %157 = sfence }
  0x1f   : > { %p176_p0 = scmp.lt.s32.totalorder %s694_s15, 1  ;;  %v1112_v0 = vlaneseq  ;;  %s708_s25 = sld [smem:[#allocation3 + $0x1]] }
  0x20   : > { %s714_s26 = sld [smem:[#allocation3 + $0x4]]  ;;  %s720_s27 = sld [smem:[#allocation3 + $0x7]] }
  0x21   : > { %s1131_s15 = smov (!%p176_p0, %s694_s15), 1  ;;  %v848_v1 = vshrl.u32 %v1112_v0, 7  ;;  %s795_s28 = smov 127   ;;  %v933_v54 = vand.u32 127, %v1112_v0 }
  0x22   : > { %s733_s21 = sshll.u32 %s1131_s15, 3  ;;  %s796_s29 = smov 1  }
  0x23   : > { %s180_s24 = scalar_lea.vmem %s1110_s2, %s733_s21  ;;  %v857_v2 = vsub.s32 0, %v848_v1  ;;  %v860_v3 = vsub.s32 1, %v848_v1  ;;  %s711_s30 = sld [smem:[#allocation3 + $0xa]]  ;;  %v948_v55 = vadd.s32 128, %v933_v54  ;;  %v207_v56 = vand.u32 15, %v933_v54 }
  0x24   : > { %v862_v4 = vld [vmem:[%s180_s24] ss:$4 sm:$0x3]  ;;  %v705_v5 = vld [vmem:[%s180_s24 + $0x1] ss:$4 sm:$0x3] }
  0x25   : > { %v189_v6 = vmax.f32 %v862_v4, %v705_v5  ;;  %v190_v7 = vadd.f32 %v705_v5, %v862_v4  ;;  %v706_v8 = vld [vmem:[%s180_s24 + $0x2] ss:$4 sm:$0x3]  ;;  %v707_v9 = vld [vmem:[%s180_s24 + $0x3] ss:$4 sm:$0x3]  ;;  %v493_v10 = vrot.slane %v862_v4, %v857_v2  ;;  %v298_v28 = vstv %s708_s25  ;;  %s185_s25 = scalar_lea.vmem %s1111_s3, %s733_s21 }
  0x26   : > { %v870_v12 = vld [vmem:[%s180_s24 + $0x1] ss:$4 sm:$0x3]  ;;  %v872_v13 = vld [vmem:[%s180_s24 + $0x2] ss:$4 sm:$0x3]  ;;  %v363_v30 = vstv %s714_s26  ;;  %v419_v34 = vstv %s720_s27 }
  0x27   : > { %v193_v14 = vmax.f32 %v189_v6, %v706_v8  ;;  %v194_v15 = vadd.f32 %v706_v8, %v190_v7  ;;  %v878_v18 = vld [vmem:[%s180_s24 + $0x3] ss:$4 sm:$0x3]  ;;  %s723_s4 = sld [smem:[#allocation3 + $0x10]]  ;;  %s717_s5 = sld [smem:[#allocation3 + $0xd]]  ;;  %v214_v57 = vand.u32 15, %v948_v55 }
  0x28   : > { %s935_s6 = sld [smem:[#allocation3 + $0x2]]  ;;  %s937_s7 = sld [smem:[#allocation3 + $0x5]]  ;;  %vm259_vm0 = vcmp.lt.s32.totalorder %v933_v54, 127  ;;  %vm966_vm1 = vcmp.lt.s32.totalorder %v207_v56, 15  ;;  %vm972_vm2 = vcmp.ge.s32.totalorder %v207_v56, 1  ;;  %vm250_vm5 = vcmp.lt.s32.totalorder %v933_v54, 1 }
  0x29   : > { %v197_v23 = vmax.f32 %v193_v14, %v707_v9  ;;  %v198_v24 = vadd.f32 %v707_v9, %v194_v15  ;;  %v326_v42 = vstv %s711_s30  ;;  %s939_s8 = sld [smem:[#allocation3 + $0x8]]  ;;  %s943_s10 = sld [smem:[#allocation3 + $0x3]]  ;;  %vm976_vm3 = vcmp.lt.s32.totalorder %v214_v57, 15 }
  0x2a   : > { %s941_s9 = sld [smem:[#allocation3]]  ;;  %s945_s11 = sld [smem:[#allocation3 + $0x6]]  ;;  %vm980_vm4 = vcmp.ge.s32.totalorder %v214_v57, 1  ;;  %vm351_vm6 = vcmp.lt.s32.totalorder %v933_v54, 16  ;;  %vm231_vm7 = vcmp.ge.s32.totalorder %v933_v54, 16  ;;  %vm472_vm8 = vcmp.lt.s32.totalorder %v933_v54, 112 }
  0x2b   : > { %v239_v25 = vrot.slane %v197_v23, %v857_v2  ;;  %v199_v26 = vmul.f32 0.25, %v198_v24  ;;  %v243_v27 = vrot.slane %v197_v23, %v860_v3  ;;  %v891_v29 = vmul.f32 %v298_v28, %v197_v23  ;;  %s950_s12 = sld [smem:[#allocation3 + $0x9]]  ;;  %s952_s13 = sld [smem:[#allocation3 + $0xc]] }
  0x2c   : > { %v895_v33 = vmul.f32 %v363_v30, %v197_v23  ;;  %v902_v37 = vmul.f32 %v419_v34, %v197_v23  ;;  %s954_s16 = sld [smem:[#allocation3 + $0xf]]  ;;  %s956_s17 = sld [smem:[#allocation3 + $0xb]]  ;;  %vm234_vm9 = vcmp.lt.s32.totalorder %v948_v55, 240  ;;  %v799_v55 = vmov 1966171168  }
  0x2d   : > { %255 = vrot.lane.b32.xlu1 %v239_v25, %s795_s28  ;;  %246 = vrot.lane.b32.xlu0 %v239_v25, %s796_s29  ;;  %v272_v31 = vrot.slane %v199_v26, %v860_v3  ;;  %v268_v32 = vrot.slane %v199_v26, %v857_v2  ;;  %v304_v35 = vrot.slane %v891_v29, %v857_v2  ;;  %v447_v43 = vstv %s723_s4  ;;  %s958_s18 = sld [smem:[#allocation3 + $0xe]]  ;;  %s960_s1 = sld [smem:[#allocation3 + $0x11]] }
  0x2e   : > { %v308_v36 = vrot.slane %v891_v29, %v860_v3  ;;  %v369_v38 = vrot.slane %v895_v33, %v857_v2  ;;  %v373_v39 = vrot.slane %v895_v33, %v860_v3  ;;  %v425_v40 = vrot.slane %v902_v37, %v857_v2  ;;  %s797_s19 = smov 16   ;;  %s798_s20 = smov 112  }
  0x2f   : > { %v429_v41 = vrot.slane %v902_v37, %v860_v3  ;;  %v391_v44 = vstv %s717_s5  ;;  %v912_v45 = vmul.f32 %v326_v42, %v199_v26  ;;  %v914_v46 = vmul.f32 %v447_v43, %v199_v26  ;;  %s291_s22 = sld [smem:[#allocation2]] }
  0x30   : > { %v916_v47 = vmul.f32 %v391_v44, %v199_v26  ;;  %v314_v60 = vstv %s935_s6  ;;  %v379_v62 = vstv %s937_s7  ;;  %v435_v63 = vstv %s939_s8 }
  0x31   : > { %257 = vrot.lane.b32.xlu1 %v243_v27, %s795_s28  ;;  %248 = vrot.lane.b32.xlu0 %v243_v27, %s796_s29  ;;  %v336_v48 = vrot.slane %v912_v45, %v860_v3  ;;  %v332_v49 = vrot.slane %v912_v45, %v857_v2  ;;  %v457_v50 = vrot.slane %v914_v46, %v860_v3  ;;  %v294_v8 = vstv %s941_s9 }
  0x32   : > { %v453_v51 = vrot.slane %v914_v46, %v857_v2  ;;  %v401_v52 = vrot.slane %v916_v47, %v860_v3  ;;  %v397_v53 = vrot.slane %v916_v47, %v857_v2  ;;  %v359_v9 = vstv %s943_s10 }
  0x33   : > { %v415_v14 = vstv %s945_s11  ;;  %v320_v15 = vstv %s950_s12  ;;  %v385_v23 = vstv %s952_s13  ;;  %v441_v26 = vstv %s954_s16 }
  0x34   : > { %v342_v27 = vstv %s956_s17  ;;  %v407_v28 = vstv %s958_s18  ;;  %v463_v30 = vstv %s960_s1 }
  0x35   : > { %277 = vrot.lane.b32.xlu1 %v272_v31, %s796_s29  ;;  %275 = vrot.lane.b32.xlu0 %v268_v32, %s796_s29 }
  0x39   : > { %285 = vrot.lane.b32.xlu1 %v272_v31, %s795_s28  ;;  %283 = vrot.lane.b32.xlu0 %v268_v32, %s795_s28 }
  0x9f   : > { %v256_v58 = vpop.permute.xlu1 %255  ;;  %v247_v59 = vpop.permute.xlu0 %246 }
  0xa3   : > { %v258_v24 = vpop.permute.xlu1 %257  ;;  %v249_v25 = vpop.permute.xlu0 %248 }
  0xa4   : > { %v260_v31 = vsel %vm259_vm0, %v256_v58, %v258_v24  ;;  %v261_v32 = vsel %vm259_vm0, %v258_v24, %v256_v58  ;;  %v251_v34 = vsel %vm250_vm5, %v247_v59, %v249_v25  ;;  %v252_v42 = vsel %vm250_vm5, %v249_v25, %v247_v59 }
  0xa5   : > { %v262_v43 = vsel %vm966_vm1, %v260_v31, 0.0  ;;  %v263_v44 = vsel %vm976_vm3, %v261_v32, 0.0  ;;  %v253_v56 = vsel %vm972_vm2, %v252_v42, 0.0  ;;  %v254_v57 = vsel %vm980_vm4, %v251_v34, 0.0 }
  0xa6   : > { %v315_v0 = vmul.f32 %v314_v60, %v262_v43  ;;  %v316_v58 = vmul.f32 %v314_v60, %v263_v44  ;;  %v380_v24 = vmul.f32 %v379_v62, %v262_v43  ;;  %v381_v22 = vmul.f32 %v379_v62, %v263_v44 }
  0xa7   : > { %v436_v20 = vmul.f32 %v435_v63, %v262_v43  ;;  %v437_v17 = vmul.f32 %v435_v63, %v263_v44  ;;  %v295_v11 = vmul.f32 %v294_v8, %v253_v56  ;;  %v296_v59 = vmul.f32 %v294_v8, %v254_v57  ;;  %v278_v25 = vpop.permute.xlu1 %277  ;;  %v276_v21 = vpop.permute.xlu0 %275 }
  0xa8   : > { %v360_v31 = vmul.f32 %v359_v9, %v253_v56  ;;  %v361_v19 = vmul.f32 %v359_v9, %v254_v57  ;;  %v416_v16 = vmul.f32 %v415_v14, %v253_v56  ;;  %v417_v32 = vmul.f32 %v415_v14, %v254_v57 }
  0xa9   : > { %v311_v42 = vadd.f32 %v304_v35, %v295_v11  ;;  %v312_v60 = vadd.f32 %v308_v36, %v296_v59  ;;  %v279_v62 = vsel %vm250_vm5, %v276_v21, %v278_v25  ;;  %v280_v63 = vsel %vm250_vm5, %v278_v25, %v276_v21 }
  0xaa   : > { %v376_v8 = vadd.f32 %v369_v38, %v360_v31  ;;  %v377_v9 = vadd.f32 %v373_v39, %v361_v19  ;;  %v432_v11 = vadd.f32 %v425_v40, %v416_v16  ;;  %v433_v29 = vadd.f32 %v429_v41, %v417_v32 }
  0xab   : > { %v317_v35 = vadd.f32 %v315_v0, %v311_v42  ;;  %v318_v36 = vadd.f32 %v316_v58, %v312_v60  ;;  %v281_v21 = vsel %vm972_vm2, %v280_v63, 0.0  ;;  %v282_v38 = vsel %vm980_vm4, %v279_v62, 0.0  ;;  %v286_v14 = vpop.permute.xlu1 %285  ;;  %v284_v34 = vpop.permute.xlu0 %283 }
  0xac   : > { %v382_v33 = vadd.f32 %v380_v24, %v376_v8  ;;  %v383_v19 = vadd.f32 %v381_v22, %v377_v9  ;;  %v438_v39 = vadd.f32 %v436_v20, %v432_v11  ;;  %v439_v43 = vadd.f32 %v437_v17, %v433_v29 }
  0xad   : > { %v321_v44 = vmul.f32 %v320_v15, %v281_v21  ;;  %v322_v16 = vmul.f32 %v320_v15, %v282_v38  ;;  %v386_v40 = vmul.f32 %v385_v23, %v281_v21  ;;  %v387_v37 = vmul.f32 %v385_v23, %v282_v38 }
  0xae   : > { %v442_v41 = vmul.f32 %v441_v26, %v281_v21  ;;  %v443_v0 = vmul.f32 %v441_v26, %v282_v38  ;;  %v287_v5 = vsel %vm259_vm0, %v284_v34, %v286_v14  ;;  %v288_v7 = vsel %vm259_vm0, %v286_v14, %v284_v34 }
  0xaf   : > { %v323_v56 = vadd.f32 %v321_v44, %v317_v35  ;;  %v324_v57 = vadd.f32 %v322_v16, %v318_v36  ;;  %v388_v20 = vadd.f32 %v386_v40, %v382_v33  ;;  %v389_v17 = vadd.f32 %v387_v37, %v383_v19 }
  0xb0   : > { %v444_v22 = vadd.f32 %v442_v41, %v438_v39  ;;  %v445_v15 = vadd.f32 %v443_v0, %v439_v43  ;;  %v289_v23 = vsel %vm966_vm1, %v287_v5, 0.0  ;;  %v290_v26 = vsel %vm976_vm3, %v288_v7, 0.0 }
  0xb1   : > { %v343_v58 = vmul.f32 %v342_v27, %v289_v23  ;;  %v344_v24 = vmul.f32 %v342_v27, %v290_v26  ;;  %v409_v59 = vmul.f32 %v407_v28, %v290_v26  ;;  %v340_v25 = vadd.f32 %v336_v48, %v324_v57 }
  0xb2   : > { %v339_v31 = vadd.f32 %v332_v49, %v323_v56  ;;  %v408_v32 = vmul.f32 %v407_v28, %v289_v23  ;;  %v464_v61 = vmul.f32 %v463_v30, %v289_v23  ;;  %v461_v6 = vadd.f32 %v457_v50, %v445_v15 }
  0xb3   : > { %v460_v27 = vadd.f32 %v453_v51, %v444_v22  ;;  %v465_v42 = vmul.f32 %v463_v30, %v290_v26  ;;  %v346_v60 = vadd.f32 %v344_v24, %v340_v25  ;;  %v405_v45 = vadd.f32 %v401_v52, %v389_v17 }
  0xb4   : > { %v345_v48 = vadd.f32 %v343_v58, %v339_v31  ;;  %v404_v49 = vadd.f32 %v397_v53, %v388_v20  ;;  %v292_v51 = vstv %s291_s22  ;;  %v506_v41 = vunpack.c.l.s4 %v799_v55 }
  0xb5   : > { %349 = vrot.lane.b32.xlu1 %v346_v60, %s797_s19  ;;  %v411_v50 = vadd.f32 %v409_v59, %v405_v45  ;;  %v467_v62 = vadd.f32 %v465_v42, %v461_v6  ;;  %v466_v46 = vadd.f32 %v464_v61, %v460_v27  ;;  %v1122_v20 = vrot.slane %v870_v12, %v857_v2 }
  0xb6   : > { %347 = vrot.lane.b32.xlu0 %v345_v48, %s797_s19  ;;  %v410_v28 = vadd.f32 %v408_v32, %v404_v49  ;;  %v507_v0 = vunpack.c.0.s8 %v506_v41  ;;  %v1123_v22 = vrot.slane %v872_v13, %v857_v2  ;;  %v1124_v23 = vrot.slane %v878_v18, %v857_v2 }
  0xb7   : > { %v1127_v59 = vrot.slane %v872_v13, %v860_v3  ;;  %v1128_v31 = vrot.slane %v878_v18, %v860_v3 }
  0xb8   : > { %v510_v7 = vsub.s32 %v507_v0, %v848_v1  ;;  %v1125_v1 = vrot.slane %v862_v4, %v860_v3 }
  0xb9   : > { %470 = vrot.lane.b32.xlu1 %v467_v62, %s798_s20 }
  0xba   : > { %468 = vrot.lane.b32.xlu0 %v466_v46, %s798_s20 }
 0x127   : > { %v350_v52 = vpop.permute.xlu1 %349 }
 0x128   : > { %v348_v30 = vpop.permute.xlu0 %347 }
 0x129   : > { %v352_v47 = vsel %vm351_vm6, %v348_v30, %v350_v52  ;;  %v353_v53 = vsel %vm351_vm6, %v350_v52, %v348_v30 }
 0x12a   : > { %v354_v63 = vsel %vm231_vm7, %v353_v53, 0.0  ;;  %v357_v8 = vadd.f32 %v352_v47, %v292_v51 }
 0x12b   : > { %v356_v9 = vadd.f32 %v354_v63, %v292_v51  ;;  %v471_v29 = vpop.permute.xlu1 %470 }
 0x12c   : > { %v413_v11 = vadd.f32 %v411_v50, %v357_v8  ;;  %v469_v35 = vpop.permute.xlu0 %468 }
 0x12d   : > { %v412_v36 = vadd.f32 %v410_v28, %v356_v9  ;;  %v473_v21 = vsel %vm472_vm8, %v469_v35, %v471_v29  ;;  %v474_v38 = vsel %vm472_vm8, %v471_v29, %v469_v35 }
 0x12e   : > { %v476_v14 = vsel %vm234_vm9, %v474_v38, 0.0 }
 0x12f   : > { %v477_v34 = vadd.f32 %v473_v21, %v412_v36  ;;  %v478_v33 = vadd.f32 %v476_v14, %v413_v11 }
 0x131   : > { %v479_v19 = vsub.f32 0.0, %v477_v34  ;;  %v480_v39 = vsub.f32 0.0, %v478_v33 }
 0x133   : > { %v481_v43 = vmul.f32 1.442695, %v479_v19  ;;  %v483_v44 = vmul.f32 1.442695, %v480_v39 }
 0x135   : > { %759 = vpow2.f32 %v481_v43 }
 0x136   : > { %761 = vpow2.f32 %v483_v44 }
 0x13f   : > { %v760_v16 = vpop.eup %759 }
 0x140   : > { %v762_v54 = vpop.eup %761  ;;  %v485_v40 = vadd.f32 1.0, %v760_v16 }
 0x141   : > { %v486_v37 = vadd.f32 1.0, %v762_v54 }
 0x142   : > { %763 = vrcp.f32 %v485_v40 }
 0x143   : > { %765 = vrcp.f32 %v486_v37 }
 0x14c   : > { %v764_v5 = vpop.eup %763 }
 0x14d   : > { %v766_v56 = vpop.eup %765  ;;  %v500_v57 = vmul.f32 %v764_v5, %v493_v10  ;;  %v537_v17 = vmul.f32 %v764_v5, %v1122_v20  ;;  %v571_v15 = vmul.f32 %v764_v5, %v1123_v22  ;;  %v605_v26 = vmul.f32 %v764_v5, %v1124_v23 }
 0x14e   : > { %v501_v58 = vmul.f32 %v766_v56, %v1125_v1  ;;  %v1126_v10 = vrot.slane %v870_v12, %v860_v3  ;;  %v572_v25 = vmul.f32 %v766_v56, %v1127_v59  ;;  %v606_v32 = vmul.f32 %v766_v56, %v1128_v31 }
 0x14f   : > { %v1129_v12 = vlaneseq }
 0x150   : > { %v538_v24 = vmul.f32 %v766_v56, %v1126_v10  ;;  %v504_v61 = vcombine.low %v500_v57, %v501_v58  ;;  %v575_v2 = vcombine.low %v571_v15, %v572_v25  ;;  %v609_v27 = vcombine.low %v605_v26, %v606_v32 }
 0x151   : > { %vm522_vm10 = vcmp.lt.s32.totalorder %v1129_v12, 256 }
 0x152   : > { %v541_v6 = vcombine.low %v537_v17, %v538_v24  ;;  %v511_v42 = vrot.slane %v504_v61, %v510_v7  ;;  %v582_v4 = vrot.slane %v575_v2, %v510_v7  ;;  %v616_v48 = vrot.slane %v609_v27, %v510_v7 }
 0x154   : > { %v548_v60 = vrot.slane %v541_v6, %v510_v7  ;;  %v518_v13 = vrot.slane %v511_v42, %v510_v7  ;;  %v589_v49 = vrot.slane %v582_v4, %v510_v7  ;;  %v623_v3 = vrot.slane %v616_v48, %v510_v7 }
 0x156   : > { %v555_v45 = vrot.slane %v548_v60, %v510_v7  ;;  %524 = vst.msk [vmem:[%s185_s25] ss:$4 sm:$0x3] %vm522_vm10, %v518_v13  ;;  %728 = vst.msk [vmem:[%s185_s25 + $0x2] ss:$4 sm:$0x3] %vm522_vm10, %v589_v49 }
 0x157   : > { %730 = vst.msk [vmem:[%s185_s25 + $0x3] ss:$4 sm:$0x3] %vm522_vm10, %v623_v3 }
 0x158   : > { %726 = vst.msk [vmem:[%s185_s25 + $0x1] ss:$4 sm:$0x3] %vm522_vm10, %v555_v45 }
 0x159 PF: > { %s15_s14 = sadd.s32 1, %s792_s14  }
 0x15a   : > { %p12_p1 = scmp.ge.s32.totalorder %s15_s14, 4  }
 0x15c   :  { %14 = sbr.rel (!%p12_p1) target bundleno = 3 (0x3), region = 73 }
 0x163   :  { %648 = vsyncpa [#allocation4], 1 }
 0x164   :  { %650 = vsyncpa [#allocation4 + $0x1], 1 }

</bundles_post_ra>
